<compile_context>
chip_gen: v5e
topology: v5e:2x2
jax: 0.10.0
libtpu: 0.0.40
codegen_flags: <defaults>
</compile_context>

<pallas_src>
import functools

import jax
import jax.numpy as jnp
from jax import lax
from jax.experimental import pallas as pl
from jax.experimental.pallas import tpu as pltpu

EPS = 1e-5


def _default_vmem_limit():
    """Per-generation scoped-VMEM limit (v5e/v6e have 128 MiB, v7x only 64 MiB)."""
    try:
        kind = jax.devices()[0].device_kind.lower()
    except Exception:
        kind = ""
    if "v5" in kind or "v6" in kind:
        return 96 * 1024 * 1024
    return 32 * 1024 * 1024     # v7x / unknown: stay conservative


_VMEM_LIMIT = _default_vmem_limit()


def _round_up(x, m):
    return (x + m - 1) // m * m


def _row_tile(rows, target=256):
    """Row tile that is a multiple of 8; rows are PADDED up to the tile instead of
    shrinking the tile to tiny / illegal sizes (old power-of-two backoff)."""
    tile = min(target, _round_up(rows, 8))
    return tile, _round_up(rows, tile)


def _head_block(bh, n, d, max_heads=8, budget=8 * 1024 * 1024):
    """Heads per attention grid step: amortize per-step overhead while keeping the
    per-step f32 scores + double-buffered bf16 q/k/v footprint under `budget`."""
    per_head = n * n * 4 * 2 + 3 * n * d * 2 * 2 + n * d * 4
    hb = max(1, min(max_heads, bh, budget // max(per_head, 1)))
    while bh % hb:
        hb -= 1
    return hb


# ----------------------------- param prep (run ONCE, outside jit) -------------
def prepare_attention_params(gamma, beta, wq, wk, wv, wo, bo, *, dim_head):
    """Transpose / bf16-cast / concatenate the weights once, outside the jitted
    forward, and fold the softmax scale into the q projection."""
    dim = gamma.shape[0]
    scale = float(dim_head) ** -0.5
    wqkv_t = jnp.concatenate(
        [(wq * scale).T, wk.T, wv.T], axis=1).astype(jnp.bfloat16)   # (dim, 3*inner)
    return dict(
        gamma=gamma.reshape(1, dim).astype(jnp.float32),
        beta=beta.reshape(1, dim).astype(jnp.float32),
        wqkv_t=wqkv_t,
        wo_t=wo.T.astype(jnp.bfloat16),                              # (inner, dim)
        bo=bo.reshape(1, dim).astype(jnp.float32),
    )


# ----------------------------- kernel 1: LayerNorm + fused QKV ----------------
def _ln_qkv_kernel(x_ref, g_ref, b_ref, wqkv_ref, q_ref, k_ref, v_ref, *, inner):
    # LayerNorm statistics in f32 (biased variance, like torch.nn.LayerNorm).
    x = x_ref[...].astype(jnp.float32)
    mean = jnp.mean(x, axis=-1, keepdims=True)
    var = jnp.mean(jnp.square(x - mean), axis=-1, keepdims=True)
    normed = (x - mean) * lax.rsqrt(var + EPS)
    normed = normed * g_ref[...].astype(jnp.float32) + b_ref[...].astype(jnp.float32)
    # One fused (tm, dim) @ (dim, 3*inner) matmul; bf16 MXU operands, f32 acc.
    qkv = jnp.dot(normed.astype(jnp.bfloat16), wqkv_ref[...],
                  preferred_element_type=jnp.float32)
    q_ref[...] = qkv[:, :inner].astype(q_ref.dtype)
    k_ref[...] = qkv[:, inner:2 * inner].astype(k_ref.dtype)
    v_ref[...] = qkv[:, 2 * inner:].astype(v_ref.dtype)


def _ln_qkv(x2, gamma2, beta2, wqkv_t, inner):
    rows, dim = x2.shape
    tm, rows_pad = _row_tile(rows)
    if rows_pad != rows:
        x2 = jnp.pad(x2, ((0, rows_pad - rows), (0, 0)))   # zero rows are LN-safe
    rowmap = lambda i: (i, 0)
    const = lambda i: (0, 0)
    out_sds = jax.ShapeDtypeStruct((rows_pad, inner), jnp.bfloat16)
    cost = pl.CostEstimate(
        flops=int(2 * rows_pad * dim * 3 * inner + 10 * rows_pad * dim),
        transcendentals=int(rows_pad),
        bytes_accessed=int(rows_pad * dim * x2.dtype.itemsize
                           + dim * 3 * inner * 2 + 3 * rows_pad * inner * 2
                           + 8 * dim),
    )
    # TODO(synk): for very large dim/inner (v7x 64 MiB VMEM), tile the (dim, 3*inner)
    # weight over an inner-N grid axis (or pipeline_mode=pl.Buffered(1)) instead of
    # holding a double-buffered full weight resident.
    q2, k2, v2 = pl.pallas_call(
        functools.partial(_ln_qkv_kernel, inner=inner),
        out_shape=(out_sds, out_sds, out_sds),
        grid=(rows_pad // tm,),
        in_specs=[
            pl.BlockSpec((tm, dim), rowmap),          # x rows tile
            pl.BlockSpec((1, dim), const),            # gamma
            pl.BlockSpec((1, dim), const),            # beta
            pl.BlockSpec((dim, 3 * inner), const),    # [Wq*scale | Wk | Wv]^T
        ],
        out_specs=(
            pl.BlockSpec((tm, inner), rowmap),
            pl.BlockSpec((tm, inner), rowmap),
            pl.BlockSpec((tm, inner), rowmap),
        ),
        compiler_params=pltpu.CompilerParams(
            dimension_semantics=("parallel",),
            vmem_limit_bytes=_VMEM_LIMIT),
        cost_estimate=cost,
    )(x2, gamma2, beta2, wqkv_t)
    if rows_pad != rows:
        q2, k2, v2 = q2[:rows], k2[:rows], v2[:rows]
    return q2, k2, v2


# ----------------------------- kernel 2: batched-head attention ---------------
def _attn_kernel(q_ref, k_ref, v_ref, o_ref):
    q = q_ref[...]                                   # (Hb, n, d) bf16; scale already in Wq
    k = k_ref[...]
    v = v_ref[...]
    # scores / softmax in f32, bf16 MXU operands; batched over the head block.
    s = jnp.einsum('hqd,hkd->hqk', q, k, preferred_element_type=jnp.float32)
    m = jnp.max(s, axis=-1, keepdims=True)
    p = jnp.exp(s - m)
    denom = jnp.sum(p, axis=-1, keepdims=True)
    # Un-normalized PV matmul; divide by the denominator on the (n, d) result
    # instead of the (n, n) weights (less VALU work / vreg pressure).
    o = jnp.einsum('hqk,hkd->hqd', p.astype(v.dtype), v,
                   preferred_element_type=jnp.float32)
    o = o * pl.reciprocal(denom, approx=True)
    o_ref[...] = o.astype(o_ref.dtype)


def _attention(q3, k3, v3):
    bh, n, d = q3.shape
    hb = _head_block(bh, n, d)
    spec = pl.BlockSpec((hb, n, d), lambda i: (i, 0, 0))
    cost = pl.CostEstimate(
        flops=int(4 * bh * n * n * d),
        transcendentals=int(bh * n * n + bh * n),
        bytes_accessed=int(4 * bh * n * d * 2),
    )
    # TODO(synk): for long sequences (n >~ 2k, esp. v7x 64 MiB VMEM) add a KV grid
    # axis with flash-style online softmax instead of the full (n, n) score tile.
    return pl.pallas_call(
        _attn_kernel,
        out_shape=jax.ShapeDtypeStruct((bh, n, d), jnp.bfloat16),
        grid=(bh // hb,),
        in_specs=[spec, spec, spec],
        out_specs=spec,
        compiler_params=pltpu.CompilerParams(
            dimension_semantics=("parallel",),
            vmem_limit_bytes=_VMEM_LIMIT),
        cost_estimate=cost,
    )(q3, k3, v3)


# ----------------------------- kernel 3: output projection (+ bias) -----------
def _out_proj_kernel(a_ref, w_ref, b_ref, o_ref):
    acc = jnp.dot(a_ref[...], w_ref[...], preferred_element_type=jnp.float32)
    o_ref[...] = (acc + b_ref[...].astype(jnp.float32)).astype(o_ref.dtype)


def _out_proj(a2, wo_t, bo2, out_dtype):
    rows, inner = a2.shape
    dim = wo_t.shape[1]
    tm, rows_pad = _row_tile(rows)
    if rows_pad != rows:
        a2 = jnp.pad(a2, ((0, rows_pad - rows), (0, 0)))
    rowmap = lambda i: (i, 0)
    const = lambda i: (0, 0)
    cost = pl.CostEstimate(
        flops=int(2 * rows_pad * inner * dim),
        transcendentals=0,
        bytes_accessed=int(rows_pad * inner * 2 + inner * dim * 2
                           + rows_pad * dim * jnp.dtype(out_dtype).itemsize),
    )
    # TODO(synk): fusing this with kernel 2 (per-head-chunk Wo^T accumulation over
    # an 'arbitrary' axis) would remove the ao HBM round trip; not done here.
    out = pl.pallas_call(
        _out_proj_kernel,
        out_shape=jax.ShapeDtypeStruct((rows_pad, dim), out_dtype),
        grid=(rows_pad // tm,),
        in_specs=[
            pl.BlockSpec((tm, inner), rowmap),   # attention output rows
            pl.BlockSpec((inner, dim), const),   # Wo^T
            pl.BlockSpec((1, dim), const),       # bias
        ],
        out_specs=pl.BlockSpec((tm, dim), rowmap),
        compiler_params=pltpu.CompilerParams(
            dimension_semantics=("parallel",),
            vmem_limit_bytes=_VMEM_LIMIT),
        cost_estimate=cost,
    )(a2, wo_t, bo2)
    return out[:rows] if rows_pad != rows else out


# ----------------------------- full forward -----------------------------------
def attention_forward(x, params, *, heads, dim_head):
    """Forward of the PyTorch `Attention` module (self-attention, context=None).

    `params` must come from `prepare_attention_params` (called outside jit).
    Returns shape (b*n//heads, heads, dim), matching the module's final .view.
    """
    b, n, dim = x.shape
    inner = heads * dim_head
    rows = b * n
    assert params["wqkv_t"].shape == (dim, 3 * inner)
    assert params["wo_t"].shape == (inner, dim)
    assert rows % heads == 0, "module's final .view requires (b*n) % heads == 0"

    x2 = x.reshape(rows, dim)
    q2, k2, v2 = _ln_qkv(x2, params["gamma"], params["beta"],
                         params["wqkv_t"], inner)               # (rows, inner) bf16

    # Module's head split is a *flat* view: (b, n, inner) -> (b, heads, n, dim_head).
    q3 = q2.reshape(b * heads, n, dim_head)
    k3 = k2.reshape(b * heads, n, dim_head)
    v3 = v2.reshape(b * heads, n, dim_head)

    ao = _attention(q3, k3, v3)                                 # (b*heads, n, d) bf16

    # Module's head merge is again a flat view: rows of size inner_dim.
    a2 = ao.reshape(rows, inner)
    out2 = _out_proj(a2, params["wo_t"], params["bo"], x.dtype)  # (rows, dim)

    # dropout(p=0.0) is the identity.
    # TODO(synk): training-mode dropout (p>0) with torch-matched RNG is not implemented.
    return out2.reshape(rows // heads, heads, dim)


# ----------------------------- pure-JAX reference ------------------------------
def attention_ref(x, gamma, beta, wq, wk, wv, wo, bo, *, heads, dim_head):
    b, n, dim = x.shape
    xf = x.astype(jnp.float32)
    mean = jnp.mean(xf, axis=-1, keepdims=True)
    var = jnp.mean(jnp.square(xf - mean), axis=-1, keepdims=True)
    xn = (xf - mean) / jnp.sqrt(var + EPS) * gamma + beta
    q = (xn @ wq.T).reshape(b, heads, n, dim_head)   # same flat view as torch .view
    k = (xn @ wk.T).reshape(b, heads, n, dim_head)
    v = (xn @ wv.T).reshape(b, heads, n, dim_head)
    s = jnp.einsum('bhid,bhjd->bhij', q, k) * (dim_head ** -0.5)
    w = jax.nn.softmax(s, axis=-1)
    ao = jnp.einsum('bhij,bhjd->bhid', w, v).reshape(-1, heads, heads * dim_head)
    return (ao @ wo.T + bo).astype(x.dtype)


if __name__ == "__main__":
    B, N, DIM = 2, 16, 128
    HEADS, DIM_HEAD = 2, 128          # lane-friendly head dim; inner_dim = 256
    INNER = HEADS * DIM_HEAD

    key = jax.random.PRNGKey(0)
    kx, kg, kb, kq, kk, kv, ko, kob = jax.random.split(key, 8)

    x = jax.random.normal(kx, (B, N, DIM), jnp.float32)
    gamma = 1.0 + 0.1 * jax.random.normal(kg, (DIM,), jnp.float32)
    beta = 0.1 * jax.random.normal(kb, (DIM,), jnp.float32)
    wq = jax.random.normal(kq, (INNER, DIM), jnp.float32) * (DIM ** -0.5)
    wk = jax.random.normal(kk, (INNER, DIM), jnp.float32) * (DIM ** -0.5)
    wv = jax.random.normal(kv, (INNER, DIM), jnp.float32) * (DIM ** -0.5)
    wo = jax.random.normal(ko, (DIM, INNER), jnp.float32) * (INNER ** -0.5)
    bo = 0.02 * jax.random.normal(kob, (DIM,), jnp.float32)

    # Weight transpose / cast / concat once, OUTSIDE jit (cached across calls).
    params = prepare_attention_params(gamma, beta, wq, wk, wv, wo, bo,
                                      dim_head=DIM_HEAD)

    fwd = jax.jit(functools.partial(attention_forward, heads=HEADS, dim_head=DIM_HEAD))
    out = fwd(x, params)
    out = jax.block_until_ready(out)

    ref = attention_ref(x, gamma, beta, wq, wk, wv, wo, bo,
                        heads=HEADS, dim_head=DIM_HEAD)
    assert out.shape == ref.shape == (B * N // HEADS, HEADS, DIM), out.shape
    max_err = float(jnp.max(jnp.abs(out.astype(jnp.float32) - ref.astype(jnp.float32))))
    # bf16 MXU operands => loosened tolerance vs the f32 reference.
    assert jnp.allclose(out, ref, atol=5e-2, rtol=5e-2), \
        f"mismatch vs reference (max abs err {max_err})"
    print("KERNEL_OK")
</pallas_src>

<mosaic_0001>
module attributes {stable_mosaic.version = 11 : i64} {
  func.func @_attn_kernel(%arg0: i32, %arg1: memref<4x16x128xbf16, #tpu.memory_space<vmem>>, %arg2: memref<4x16x128xbf16, #tpu.memory_space<vmem>>, %arg3: memref<4x16x128xbf16, #tpu.memory_space<vmem>>, %arg4: memref<4x16x128xbf16, #tpu.memory_space<vmem>>) attributes {dimension_semantics = [#tpu.dimension_semantics<parallel>], iteration_bounds = array<i64: 1>, scalar_prefetch = 0 : i64, scratch_operands = 0 : i64, tpu.core_type = #tpu.core_type<tc>, window_params = [{transform_indices = @transform_0, window_bounds = array<i64: 4, 16, 128>}, {transform_indices = @transform_1, window_bounds = array<i64: 4, 16, 128>}, {transform_indices = @transform_2, window_bounds = array<i64: 4, 16, 128>}, {transform_indices = @transform_3, window_bounds = array<i64: 4, 16, 128>}]} {
    %c0 = arith.constant 0 : index
    %c0_0 = arith.constant 0 : index
    %c0_1 = arith.constant 0 : index
    %0 = vector.load %arg1[%c0, %c0_0, %c0_1] : memref<4x16x128xbf16, #tpu.memory_space<vmem>>, vector<4x16x128xbf16>
    %c0_2 = arith.constant 0 : index
    %c0_3 = arith.constant 0 : index
    %c0_4 = arith.constant 0 : index
    %1 = vector.load %arg2[%c0_2, %c0_3, %c0_4] : memref<4x16x128xbf16, #tpu.memory_space<vmem>>, vector<4x16x128xbf16>
    %c0_5 = arith.constant 0 : index
    %c0_6 = arith.constant 0 : index
    %c0_7 = arith.constant 0 : index
    %2 = vector.load %arg3[%c0_5, %c0_6, %c0_7] : memref<4x16x128xbf16, #tpu.memory_space<vmem>>, vector<4x16x128xbf16>
    "tpu.trace_start"() <{level = 10 : i32, message = "hqd,hkd->hqk"}> : () -> ()
    %cst = arith.constant dense<0.000000e+00> : vector<4x16x16xf32>
    %3 = tpu.matmul %0, %1, %cst {dimension_numbers = #tpu.dot_dimension_numbers<[2], [2], [1], [1], [0, 0, 0, 1, 1, 1], [0], [0]>} : vector<4x16x128xbf16>, vector<4x16x128xbf16>, vector<4x16x16xf32> -> vector<4x16x16xf32>
    "tpu.trace_stop"() : () -> ()
    %cst_8 = arith.constant dense<0xFF800000> : vector<4x16xf32>
    %4 = vector.multi_reduction <maximumf>, %3, %cst_8 [2] : vector<4x16x16xf32> to vector<4x16xf32>
    %5 = vector.shape_cast %4 : vector<4x16xf32> to vector<4x16x1xf32>
    %6 = vector.broadcast %5 : vector<4x16x1xf32> to vector<4x16x16xf32>
    %7 = arith.subf %3, %6 : vector<4x16x16xf32>
    %8 = math.exp %7 : vector<4x16x16xf32>
    %cst_9 = arith.constant dense<0.000000e+00> : vector<4x16xf32>
    %9 = vector.multi_reduction <add>, %8, %cst_9 [2] : vector<4x16x16xf32> to vector<4x16xf32>
    %10 = vector.shape_cast %9 : vector<4x16xf32> to vector<4x16x1xf32>
    %11 = arith.truncf %8 : vector<4x16x16xf32> to vector<4x16x16xbf16>
    "tpu.trace_start"() <{level = 10 : i32, message = "hqk,hkd->hqd"}> : () -> ()
    %cst_10 = arith.constant dense<0.000000e+00> : vector<4x16x128xf32>
    %12 = tpu.matmul %11, %2, %cst_10 {dimension_numbers = #tpu.dot_dimension_numbers<[2], [1], [1], [2], [0, 0, 0, 1, 1, 2], [0], [0]>} : vector<4x16x16xbf16>, vector<4x16x128xbf16>, vector<4x16x128xf32> -> vector<4x16x128xf32>
    "tpu.trace_stop"() : () -> ()
    %13 = tpu.reciprocal %10 {approx = true} : vector<4x16x1xf32> -> vector<4x16x1xf32>
    %14 = vector.broadcast %13 : vector<4x16x1xf32> to vector<4x16x128xf32>
    %15 = arith.mulf %12, %14 : vector<4x16x128xf32>
    %16 = arith.truncf %15 : vector<4x16x128xf32> to vector<4x16x128xbf16>
    %c0_11 = arith.constant 0 : index
    %c0_12 = arith.constant 0 : index
    %c0_13 = arith.constant 0 : index
    %17 = vector.load %arg4[%c0_11, %c0_12, %c0_13] : memref<4x16x128xbf16, #tpu.memory_space<vmem>>, vector<4x16x128xbf16>
    tpu.vector_store %arg4[%c0_11, %c0_12, %c0_13], %16 {strides = array<i32>} : memref<4x16x128xbf16, #tpu.memory_space<vmem>>, vector<4x16x128xbf16>,
    return
  }
  func.func @transform_0(%arg0: i32) -> (i32, i32, i32) {
    %c0_i32 = arith.constant 0 : i32
    %c0_i32_0 = arith.constant 0 : i32
    %c0_i32_1 = arith.constant 0 : i32
    return %arg0, %c0_i32, %c0_i32_0 : i32, i32, i32
  }
  func.func @transform_1(%arg0: i32) -> (i32, i32, i32) {
    %c0_i32 = arith.constant 0 : i32
    %c0_i32_0 = arith.constant 0 : i32
    %c0_i32_1 = arith.constant 0 : i32
    return %arg0, %c0_i32, %c0_i32_0 : i32, i32, i32
  }
  func.func @transform_2(%arg0: i32) -> (i32, i32, i32) {
    %c0_i32 = arith.constant 0 : i32
    %c0_i32_0 = arith.constant 0 : i32
    %c0_i32_1 = arith.constant 0 : i32
    return %arg0, %c0_i32, %c0_i32_0 : i32, i32, i32
  }
  func.func @transform_3(%arg0: i32) -> (i32, i32, i32) {
    %c0_i32 = arith.constant 0 : i32
    %c0_i32_0 = arith.constant 0 : i32
    %c0_i32_1 = arith.constant 0 : i32
    return %arg0, %c0_i32, %c0_i32_0 : i32, i32, i32
  }
}

module attributes {stable_mosaic.version = 11 : i64} {
  func.func @_ln_qkv_kernel(%arg0: i32, %arg1: memref<32x128xf32, #tpu.memory_space<vmem>>, %arg2: memref<1x128xf32, #tpu.memory_space<vmem>>, %arg3: memref<1x128xf32, #tpu.memory_space<vmem>>, %arg4: memref<128x768xbf16, #tpu.memory_space<vmem>>, %arg5: memref<32x256xbf16, #tpu.memory_space<vmem>>, %arg6: memref<32x256xbf16, #tpu.memory_space<vmem>>, %arg7: memref<32x256xbf16, #tpu.memory_space<vmem>>) attributes {dimension_semantics = [#tpu.dimension_semantics<parallel>], iteration_bounds = array<i64: 1>, scalar_prefetch = 0 : i64, scratch_operands = 0 : i64, tpu.core_type = #tpu.core_type<tc>, window_params = [{transform_indices = @transform_0, window_bounds = array<i64: 32, 128>}, {pipeline_mode = #tpu.pipeline_mode<synchronous>, transform_indices = @transform_1, window_bounds = array<i64: 1, 128>}, {pipeline_mode = #tpu.pipeline_mode<synchronous>, transform_indices = @transform_2, window_bounds = array<i64: 1, 128>}, {pipeline_mode = #tpu.pipeline_mode<synchronous>, transform_indices = @transform_3, window_bounds = array<i64: 128, 768>}, {transform_indices = @transform_4, window_bounds = array<i64: 32, 256>}, {transform_indices = @transform_5, window_bounds = array<i64: 32, 256>}, {transform_indices = @transform_6, window_bounds = array<i64: 32, 256>}]} {
    %c0 = arith.constant 0 : index
    %c0_0 = arith.constant 0 : index
    %0 = vector.load %arg1[%c0, %c0_0] : memref<32x128xf32, #tpu.memory_space<vmem>>, vector<32x128xf32>
    %cst = arith.constant dense<0.000000e+00> : vector<32xf32>
    %1 = vector.multi_reduction <add>, %0, %cst [1] : vector<32x128xf32> to vector<32xf32>
    %2 = vector.shape_cast %1 : vector<32xf32> to vector<32x1xf32>
    %cst_1 = arith.constant 1.280000e+02 : f32
    %3 = vector.broadcast %cst_1 : f32 to vector<32x1xf32>
    %4 = arith.divf %2, %3 : vector<32x1xf32>
    %5 = vector.broadcast %4 : vector<32x1xf32> to vector<32x128xf32>
    %6 = arith.subf %0, %5 : vector<32x128xf32>
    %7 = arith.mulf %6, %6 : vector<32x128xf32>
    %cst_2 = arith.constant dense<0.000000e+00> : vector<32xf32>
    %8 = vector.multi_reduction <add>, %7, %cst_2 [1] : vector<32x128xf32> to vector<32xf32>
    %9 = vector.shape_cast %8 : vector<32xf32> to vector<32x1xf32>
    %cst_3 = arith.constant 1.280000e+02 : f32
    %10 = vector.broadcast %cst_3 : f32 to vector<32x1xf32>
    %11 = arith.divf %9, %10 : vector<32x1xf32>
    %12 = vector.broadcast %4 : vector<32x1xf32> to vector<32x128xf32>
    %13 = arith.subf %0, %12 : vector<32x128xf32>
    %cst_4 = arith.constant 9.99999974E-6 : f32
    %14 = vector.broadcast %cst_4 : f32 to vector<32x1xf32>
    %15 = arith.addf %11, %14 : vector<32x1xf32>
    %16 = math.rsqrt %15 : vector<32x1xf32>
    %17 = vector.broadcast %16 : vector<32x1xf32> to vector<32x128xf32>
    %18 = arith.mulf %13, %17 : vector<32x128xf32>
    %c0_5 = arith.constant 0 : index
    %c0_6 = arith.constant 0 : index
    %19 = vector.load %arg2[%c0_5, %c0_6] : memref<1x128xf32, #tpu.memory_space<vmem>>, vector<1x128xf32>
    %20 = vector.broadcast %19 : vector<1x128xf32> to vector<32x128xf32>
    %21 = arith.mulf %18, %20 : vector<32x128xf32>
    %c0_7 = arith.constant 0 : index
    %c0_8 = arith.constant 0 : index
    %22 = vector.load %arg3[%c0_7, %c0_8] : memref<1x128xf32, #tpu.memory_space<vmem>>, vector<1x128xf32>
    %23 = vector.broadcast %22 : vector<1x128xf32> to vector<32x128xf32>
    %24 = arith.addf %21, %23 : vector<32x128xf32>
    %25 = arith.truncf %24 : vector<32x128xf32> to vector<32x128xbf16>
    %c0_9 = arith.constant 0 : index
    %c0_10 = arith.constant 0 : index
    %26 = vector.load %arg4[%c0_9, %c0_10] : memref<128x768xbf16, #tpu.memory_space<vmem>>, vector<128x768xbf16>
    %cst_11 = arith.constant dense<0.000000e+00> : vector<32x768xf32>
    %27 = tpu.matmul %25, %26, %cst_11 {dimension_numbers = #tpu.dot_dimension_numbers<[1], [0], [0], [1], [0, 0, 1, 1], [], []>} : vector<32x128xbf16>, vector<128x768xbf16>, vector<32x768xf32> -> vector<32x768xf32>
    %28 = vector.extract_strided_slice %27 {offsets = [0, 0], sizes = [32, 256], strides = [1, 1]} : vector<32x768xf32> to vector<32x256xf32>
    %29 = arith.truncf %28 : vector<32x256xf32> to vector<32x256xbf16>
    %c0_12 = arith.constant 0 : index
    %c0_13 = arith.constant 0 : index
    %30 = vector.load %arg5[%c0_12, %c0_13] : memref<32x256xbf16, #tpu.memory_space<vmem>>, vector<32x256xbf16>
    tpu.vector_store %arg5[%c0_12, %c0_13], %29 {strides = array<i32>} : memref<32x256xbf16, #tpu.memory_space<vmem>>, vector<32x256xbf16>,
    %31 = vector.extract_strided_slice %27 {offsets = [0, 256], sizes = [32, 256], strides = [1, 1]} : vector<32x768xf32> to vector<32x256xf32>
    %32 = arith.truncf %31 : vector<32x256xf32> to vector<32x256xbf16>
    %c0_14 = arith.constant 0 : index
    %c0_15 = arith.constant 0 : index
    %33 = vector.load %arg6[%c0_14, %c0_15] : memref<32x256xbf16, #tpu.memory_space<vmem>>, vector<32x256xbf16>
    tpu.vector_store %arg6[%c0_14, %c0_15], %32 {strides = array<i32>} : memref<32x256xbf16, #tpu.memory_space<vmem>>, vector<32x256xbf16>,
    %34 = vector.extract_strided_slice %27 {offsets = [0, 512], sizes = [32, 256], strides = [1, 1]} : vector<32x768xf32> to vector<32x256xf32>
    %35 = arith.truncf %34 : vector<32x256xf32> to vector<32x256xbf16>
    %c0_16 = arith.constant 0 : index
    %c0_17 = arith.constant 0 : index
    %36 = vector.load %arg7[%c0_16, %c0_17] : memref<32x256xbf16, #tpu.memory_space<vmem>>, vector<32x256xbf16>
    tpu.vector_store %arg7[%c0_16, %c0_17], %35 {strides = array<i32>} : memref<32x256xbf16, #tpu.memory_space<vmem>>, vector<32x256xbf16>,
    return
  }
  func.func @transform_0(%arg0: i32) -> (i32, i32) {
    %c0_i32 = arith.constant 0 : i32
    %c0_i32_0 = arith.constant 0 : i32
    return %arg0, %c0_i32 : i32, i32
  }
  func.func @transform_1(%arg0: i32) -> (i32, i32) {
    %c0_i32 = arith.constant 0 : i32
    %c0_i32_0 = arith.constant 0 : i32
    %c0_i32_1 = arith.constant 0 : i32
    return %c0_i32, %c0_i32_0 : i32, i32
  }
  func.func @transform_2(%arg0: i32) -> (i32, i32) {
    %c0_i32 = arith.constant 0 : i32
    %c0_i32_0 = arith.constant 0 : i32
    %c0_i32_1 = arith.constant 0 : i32
    return %c0_i32, %c0_i32_0 : i32, i32
  }
  func.func @transform_3(%arg0: i32) -> (i32, i32) {
    %c0_i32 = arith.constant 0 : i32
    %c0_i32_0 = arith.constant 0 : i32
    %c0_i32_1 = arith.constant 0 : i32
    return %c0_i32, %c0_i32_0 : i32, i32
  }
  func.func @transform_4(%arg0: i32) -> (i32, i32) {
    %c0_i32 = arith.constant 0 : i32
    %c0_i32_0 = arith.constant 0 : i32
    return %arg0, %c0_i32 : i32, i32
  }
  func.func @transform_5(%arg0: i32) -> (i32, i32) {
    %c0_i32 = arith.constant 0 : i32
    %c0_i32_0 = arith.constant 0 : i32
    return %arg0, %c0_i32 : i32, i32
  }
  func.func @transform_6(%arg0: i32) -> (i32, i32) {
    %c0_i32 = arith.constant 0 : i32
    %c0_i32_0 = arith.constant 0 : i32
    return %arg0, %c0_i32 : i32, i32
  }
}

module attributes {stable_mosaic.version = 11 : i64} {
  func.func @_out_proj_kernel(%arg0: i32, %arg1: memref<32x256xbf16, #tpu.memory_space<vmem>>, %arg2: memref<256x128xbf16, #tpu.memory_space<vmem>>, %arg3: memref<1x128xf32, #tpu.memory_space<vmem>>, %arg4: memref<32x128xf32, #tpu.memory_space<vmem>>) attributes {dimension_semantics = [#tpu.dimension_semantics<parallel>], iteration_bounds = array<i64: 1>, scalar_prefetch = 0 : i64, scratch_operands = 0 : i64, tpu.core_type = #tpu.core_type<tc>, window_params = [{transform_indices = @transform_0, window_bounds = array<i64: 32, 256>}, {pipeline_mode = #tpu.pipeline_mode<synchronous>, transform_indices = @transform_1, window_bounds = array<i64: 256, 128>}, {pipeline_mode = #tpu.pipeline_mode<synchronous>, transform_indices = @transform_2, window_bounds = array<i64: 1, 128>}, {transform_indices = @transform_3, window_bounds = array<i64: 32, 128>}]} {
    %c0 = arith.constant 0 : index
    %c0_0 = arith.constant 0 : index
    %0 = vector.load %arg1[%c0, %c0_0] : memref<32x256xbf16, #tpu.memory_space<vmem>>, vector<32x256xbf16>
    %c0_1 = arith.constant 0 : index
    %c0_2 = arith.constant 0 : index
    %1 = vector.load %arg2[%c0_1, %c0_2] : memref<256x128xbf16, #tpu.memory_space<vmem>>, vector<256x128xbf16>
    %cst = arith.constant dense<0.000000e+00> : vector<32x128xf32>
    %2 = tpu.matmul %0, %1, %cst {dimension_numbers = #tpu.dot_dimension_numbers<[1], [0], [0], [1], [0, 0, 1, 1], [], []>} : vector<32x256xbf16>, vector<256x128xbf16>, vector<32x128xf32> -> vector<32x128xf32>
    %c0_3 = arith.constant 0 : index
    %c0_4 = arith.constant 0 : index
    %3 = vector.load %arg3[%c0_3, %c0_4] : memref<1x128xf32, #tpu.memory_space<vmem>>, vector<1x128xf32>
    %4 = vector.broadcast %3 : vector<1x128xf32> to vector<32x128xf32>
    %5 = arith.addf %2, %4 : vector<32x128xf32>
    %c0_5 = arith.constant 0 : index
    %c0_6 = arith.constant 0 : index
    %6 = vector.load %arg4[%c0_5, %c0_6] : memref<32x128xf32, #tpu.memory_space<vmem>>, vector<32x128xf32>
    tpu.vector_store %arg4[%c0_5, %c0_6], %5 {strides = array<i32>} : memref<32x128xf32, #tpu.memory_space<vmem>>, vector<32x128xf32>,
    return
  }
  func.func @transform_0(%arg0: i32) -> (i32, i32) {
    %c0_i32 = arith.constant 0 : i32
    %c0_i32_0 = arith.constant 0 : i32
    return %arg0, %c0_i32 : i32, i32
  }
  func.func @transform_1(%arg0: i32) -> (i32, i32) {
    %c0_i32 = arith.constant 0 : i32
    %c0_i32_0 = arith.constant 0 : i32
    %c0_i32_1 = arith.constant 0 : i32
    return %c0_i32, %c0_i32_0 : i32, i32
  }
  func.func @transform_2(%arg0: i32) -> (i32, i32) {
    %c0_i32 = arith.constant 0 : i32
    %c0_i32_0 = arith.constant 0 : i32
    %c0_i32_1 = arith.constant 0 : i32
    return %c0_i32, %c0_i32_0 : i32, i32
  }
  func.func @transform_3(%arg0: i32) -> (i32, i32) {
    %c0_i32 = arith.constant 0 : i32
    %c0_i32_0 = arith.constant 0 : i32
    return %arg0, %c0_i32 : i32, i32
  }
}

</mosaic_0001>

<bundles_post_ra>
// kernel: attention_forward.3
= control target key start
LH: loop header
LB: loop body
LE: loop exit
PB: predicated region body
PF: predicated region fallthrough
CT: control target
= control target key end

     0   :  { %12 = vsyncpa [#allocation3], 0  ;;  %s1134_s0 = inlined_call_operand.hbm [shape: f32[32,128], index: 0, kind: input, shape index: {}]   ;;  %s1135_s1 = inlined_call_operand.vmem [shape: f32[1,128], index: 1, kind: input, shape index: {}]   ;;  %s1136_s2 = inlined_call_operand.hbm [shape: f32[1,128], index: 2, kind: input, shape index: {}]   ;;  %s1137_s3 = inlined_call_operand.hbm [shape: bf16[128,768], index: 3, kind: input, shape index: {}]   ;;  %s1138_s4 = inlined_call_operand.vmem [shape: bf16[32,256], index: 4, kind: output, shape index: {0}]   ;;  %s1139_s5 = inlined_call_operand.vmem [shape: bf16[32,256], index: 5, kind: output, shape index: {1}]   ;;  %s1140_s6 = inlined_call_operand.vmem [shape: bf16[32,256], index: 6, kind: output, shape index: {2}]  }
   0x1   :  { %13 = vsyncpa [#allocation5], 0  ;;  %s34_s23 = sshll.u32 %s1136_s2, 4  ;;  %s966_s24 = smov [#allocation4]   ;;  %s35_s23 = int_to_ptr.hbm [resolvable:$true] %s34_s23 }
   0x2   :  { %s36_s25 = sshll.u32 %s966_s24, 4  ;;  %s18_s28 = sshll.u32 %s1134_s0, 4  ;;  %s37_s25 = int_to_ptr.vmem [resolvable:$true] %s36_s25  ;;  %s19_s28 = int_to_ptr.hbm [resolvable:$true] %s18_s28 }
   0x3   :  { %39 = dma.hbm_to_vmem [thread:$0]  %s35_s23, 16, %s37_s25, [#allocation5]  }
   0x4   :  { %s967_s29 = smov [#allocation2]   ;;  %s968_s7 = smov 128  }
   0x5   :  { %s20_s30 = sshll.u32 %s967_s29, 4  ;;  %s969_s8 = smov 8   ;;  %s21_s30 = int_to_ptr.vmem [resolvable:$true] %s20_s30 }
   0x6   :  { %26 = dma.hbm_to_vmem [thread:$0]  %s19_s28, 512, %s21_s30, [#allocation3], %s968_s7, %s968_s7, %s969_s8  }
   0x7   :  { %s44_s2 = sshll.u32 %s1137_s3, 4  ;;  %s970_s11 = smov [#allocation6]   ;;  %s45_s2 = int_to_ptr.hbm [resolvable:$true] %s44_s2 }
   0x8   :  { %s46_s12 = sshll.u32 %s970_s11, 4  ;;  %s971_s13 = smov 384   ;;  %s47_s12 = int_to_ptr.vmem [resolvable:$true] %s46_s12 }
   0x9   :  { %s972_s14 = smov 24  }
   0xa   :  { %52 = dma.hbm_to_vmem [thread:$0]  %s45_s2, 6144, %s47_s12, [#allocation5], %s971_s13, %s971_s13, %s972_s14  }
   0xb   :  { %962 = dma.done.wait [#allocation3], 512  }
   0xc   :  { %963 = vsyncadd [#allocation3], 4294966784 }
   0xd   :  { %964 = dma.done.wait [#allocation5], 6160  }
   0xe   :  { %965 = vsyncadd [#allocation5], 4294961136  ;;  %v67_v0 = vld [vmem:[#allocation2 + $0x10] sm:$0xff]  ;;  %v65_v1 = vld [vmem:[#allocation2] sm:$0xff]  ;;  %v973_v4 = vmov 128.0  }
   0xf   :  { %73 = vadd.xlane.f32.xlu1 %v67_v0  ;;  %69 = vadd.xlane.f32.xlu0 %v65_v1  ;;  %v68_v2 = vld [vmem:[#allocation2 + $0x18] sm:$0xff]  ;;  %v66_v3 = vld [vmem:[#allocation2 + $0x8] sm:$0xff]  ;;  %880 = vrcp.f32 %v973_v4  ;;  %v784_v27 = vld [vmem:[#allocation6 + $0x150] sm:$0xf] }
  0x10   :  { %v851_v28 = vld [vmem:[#allocation6 + $0x164] sm:$0xf0]  ;;  %v848_v29 = vld [vmem:[#allocation6 + $0x154] sm:$0xf]  ;;  %v786_v31 = vld [vmem:[#allocation6 + $0x168] sm:$0xf0] }
  0x11   :  { %v785_v30 = vor.u32 %v851_v28, %v784_v27  ;;  %v792_v32 = vld [vmem:[#allocation6 + $0x158] sm:$0xf]  ;;  %v852_v33 = vld [vmem:[#allocation6 + $0x16c] sm:$0xf0]  ;;  %v789_v34 = vor.u32 %v848_v29, %v786_v31  ;;  %v849_v36 = vld [vmem:[#allocation6 + $0x15c] sm:$0xf] }
  0x12   :  { %v793_v35 = vor.u32 %v852_v33, %v792_v32  ;;  %v794_v37 = vld [vmem:[#allocation6 + $0x170] sm:$0xf0]  ;;  %v760_v39 = vld [vmem:[#allocation6 + $0x120] sm:$0xf]  ;;  %v845_v40 = vld [vmem:[#allocation6 + $0x134] sm:$0xf0] }
  0x13   :  { %462 = vmatpush.bf16.msra.mxu0 %v785_v30  ;;  %v797_v38 = vor.u32 %v849_v36, %v794_v37  ;;  %481 = vmatpush.bf16.msra.mxu1 %v789_v34  ;;  %v842_v41 = vld [vmem:[#allocation6 + $0x124] sm:$0xf]  ;;  %v761_v42 = vor.u32 %v845_v40, %v760_v39  ;;  %v762_v43 = vld [vmem:[#allocation6 + $0x138] sm:$0xf0]  ;;  %v768_v44 = vld [vmem:[#allocation6 + $0x128] sm:$0xf] }
  0x14   :  { %500 = vmatpush.bf16.msra.mxu2 %v793_v35  ;;  %v846_v45 = vld [vmem:[#allocation6 + $0x13c] sm:$0xf0]  ;;  %v765_v46 = vor.u32 %v842_v41, %v762_v43  ;;  %v843_v48 = vld [vmem:[#allocation6 + $0x12c] sm:$0xf]  ;;  %v770_v49 = vld [vmem:[#allocation6 + $0x140] sm:$0xf0] }
  0x15   :  { %v881_v5 = vpop.eup %880  ;;  %519 = vmatpush.bf16.msra.mxu3 %v797_v38  ;;  %v769_v47 = vor.u32 %v846_v45, %v768_v44  ;;  %v773_v50 = vor.u32 %v843_v48, %v770_v49  ;;  %v736_v51 = vld [vmem:[#allocation6 + $0xf0] sm:$0xf]  ;;  %v839_v52 = vld [vmem:[#allocation6 + $0x104] sm:$0xf0]  ;;  %v836_v53 = vld [vmem:[#allocation6 + $0xf4] sm:$0xf] }
  0x16   :  { %v78_v6 = vmul.f32 128.0, %v881_v5  ;;  %vm82_vm0 = vweird.f32 %v881_v5  ;;  %v737_v54 = vor.u32 %v839_v52, %v736_v51  ;;  %v738_v55 = vld [vmem:[#allocation6 + $0x108] sm:$0xf0]  ;;  %v744_v56 = vld [vmem:[#allocation6 + $0xf8] sm:$0xf] }
  0x17   :  { %75 = vadd.xlane.f32.xlu1 %v68_v2  ;;  %71 = vadd.xlane.f32.xlu0 %v66_v3  ;;  %v840_v57 = vld [vmem:[#allocation6 + $0x10c] sm:$0xf0]  ;;  %v741_v58 = vor.u32 %v836_v53, %v738_v55  ;;  %v837_v60 = vld [vmem:[#allocation6 + $0xfc] sm:$0xf]  ;;  %v746_v61 = vld [vmem:[#allocation6 + $0x110] sm:$0xf0] }
  0x18   :  { %v79_v7 = vsub.f32 1.0, %v78_v6  ;;  %463 = vmatpush.bf16.msra.mxu0 %v761_v42  ;;  %482 = vmatpush.bf16.msra.mxu1 %v765_v46  ;;  %v745_v59 = vor.u32 %v840_v57, %v744_v56  ;;  %v749_v62 = vor.u32 %v837_v60, %v746_v61  ;;  %v712_v63 = vld [vmem:[#allocation6 + $0xc0] sm:$0xf]  ;;  %v720_v4 = vld [vmem:[#allocation6 + $0xc8] sm:$0xf] }
  0x19   :  { %501 = vmatpush.bf16.msra.mxu2 %v769_v47  ;;  %520 = vmatpush.bf16.msra.mxu3 %v773_v50  ;;  %v664_v28 = vld [vmem:[#allocation6 + $0x60] sm:$0xf]  ;;  %v821_v29 = vld [vmem:[#allocation6 + $0x74] sm:$0xf0]  ;;  %v818_v30 = vld [vmem:[#allocation6 + $0x64] sm:$0xf] }
  0x1a   :  { %v80_v8 = vmul.f32 %v881_v5, %v79_v7  ;;  %v665_v31 = vor.u32 %v821_v29, %v664_v28  ;;  %v666_v32 = vld [vmem:[#allocation6 + $0x78] sm:$0xf0]  ;;  %v672_v33 = vld [vmem:[#allocation6 + $0x68] sm:$0xf]  ;;  %v822_v34 = vld [vmem:[#allocation6 + $0x7c] sm:$0xf0] }
  0x1b   :  { %v669_v35 = vor.u32 %v818_v30, %v666_v32  ;;  %v673_v36 = vor.u32 %v822_v34, %v672_v33  ;;  %v819_v37 = vld [vmem:[#allocation6 + $0x6c] sm:$0xf]  ;;  %v674_v38 = vld [vmem:[#allocation6 + $0x80] sm:$0xf0]  ;;  %v640_v40 = vld [vmem:[#allocation6 + $0x30] sm:$0xf] }
  0x1c   :  { %v81_v9 = vadd.f32 %v881_v5, %v80_v8  ;;  %464 = vmatpush.bf16.msra.mxu0 %v737_v54  ;;  %483 = vmatpush.bf16.msra.mxu1 %v741_v58  ;;  %v831_v8 = vld [vmem:[#allocation6 + $0xcc] sm:$0xf]  ;;  %v677_v39 = vor.u32 %v819_v37, %v674_v38  ;;  %v815_v41 = vld [vmem:[#allocation6 + $0x44] sm:$0xf0]  ;;  %v812_v42 = vld [vmem:[#allocation6 + $0x34] sm:$0xf] }
  0x1d   :  { %502 = vmatpush.bf16.msra.mxu2 %v745_v59  ;;  %521 = vmatpush.bf16.msra.mxu3 %v749_v62  ;;  %v641_v43 = vor.u32 %v815_v41, %v640_v40  ;;  %v642_v44 = vld [vmem:[#allocation6 + $0x48] sm:$0xf0]  ;;  %v648_v45 = vld [vmem:[#allocation6 + $0x38] sm:$0xf]  ;;  %v816_v46 = vld [vmem:[#allocation6 + $0x4c] sm:$0xf0] }
  0x1e   :  { %v1018_v10 = vsel %vm82_vm0, %v881_v5, %v81_v9  ;;  %v834_v5 = vld [vmem:[#allocation6 + $0xdc] sm:$0xf0]  ;;  %v722_v9 = vld [vmem:[#allocation6 + $0xe0] sm:$0xf0]  ;;  %v645_v48 = vor.u32 %v812_v42, %v642_v44  ;;  %v649_v49 = vor.u32 %v816_v46, %v648_v45  ;;  %v813_v50 = vld [vmem:[#allocation6 + $0x3c] sm:$0xf] }
  0x1f   :  { %v721_v7 = vor.u32 %v834_v5, %v720_v4  ;;  %v650_v51 = vld [vmem:[#allocation6 + $0x50] sm:$0xf0]  ;;  %v616_v55 = vld [vmem:[#allocation6] sm:$0xf]  ;;  %v809_v56 = vld [vmem:[#allocation6 + $0x14] sm:$0xf0] }
  0x20   :  { %v653_v54 = vor.u32 %v813_v50, %v650_v51  ;;  %v806_v57 = vld [vmem:[#allocation6 + $0x4] sm:$0xf]  ;;  %v617_v59 = vor.u32 %v809_v56, %v616_v55  ;;  %v618_v60 = vld [vmem:[#allocation6 + $0x18] sm:$0xf0]  ;;  %v800_v5 = vld [vmem:[#allocation6 + $0x160] sm:$0xf] }
  0x21   :  { %503 = vmatpush.bf16.msra.mxu2 %v721_v7  ;;  %v621_v62 = vor.u32 %v806_v57, %v618_v60  ;;  %v850_v7 = vld [vmem:[#allocation6 + $0x164] sm:$0xf]  ;;  %v754_v33 = vld [vmem:[#allocation6 + $0x118] sm:$0xf0]  ;;  %v728_v37 = vld [vmem:[#allocation6 + $0xd0] sm:$0xf] }
  0x22   :  { %v838_v32 = vld [vmem:[#allocation6 + $0x104] sm:$0xf]  ;;  %v835_v38 = vld [vmem:[#allocation6 + $0xe4] sm:$0xf0]  ;;  %v832_v40 = vld [vmem:[#allocation6 + $0xd4] sm:$0xf] }
  0x23   :  { %v730_v41 = vld [vmem:[#allocation6 + $0xe8] sm:$0xf0]  ;;  %v729_v44 = vor.u32 %v835_v38, %v728_v37  ;;  %v829_v55 = vld [vmem:[#allocation6 + $0xb4] sm:$0xf0]  ;;  %v826_v56 = vld [vmem:[#allocation6 + $0xa4] sm:$0xf] }
  0x24   :  { %v733_v46 = vor.u32 %v832_v40, %v730_v41  ;;  %v706_v60 = vld [vmem:[#allocation6 + $0xb8] sm:$0xf0] }
  0x82   :  { %v74_v11 = vpop.xlane.xlu1 %73  ;;  %v70_v12 = vpop.xlane.xlu0 %69 }
  0x83   :  { %v86_v13 = vmul.f32 %v1018_v10, %v74_v11  ;;  %v84_v14 = vmul.f32 %v1018_v10, %v70_v12  ;;  %v725_v11 = vor.u32 %v831_v8, %v722_v9  ;;  %v688_v12 = vld [vmem:[#allocation6 + $0x90] sm:$0xf] }
  0x85   :  { %v1022_v15 = vsub.f32 %v67_v0, %v86_v13  ;;  %v1024_v16 = vsub.f32 %v65_v1, %v84_v14  ;;  %v833_v0 = vld [vmem:[#allocation6 + $0xd4] sm:$0xf0]  ;;  %v830_v1 = vld [vmem:[#allocation6 + $0xc4] sm:$0xf]  ;;  %v827_v13 = vld [vmem:[#allocation6 + $0xa4] sm:$0xf0]  ;;  %522 = vmatpush.bf16.msra.mxu3 %v725_v11 }
  0x86   :  { %v824_v14 = vld [vmem:[#allocation6 + $0x94] sm:$0xf] }
  0x87   :  { %v94_v17 = vmul.f32 %v1022_v15, %v1022_v15  ;;  %v92_v18 = vmul.f32 %v1024_v16, %v1024_v16 }
  0x89   :  { %100 = vadd.xlane.f32.xlu0 %v94_v17  ;;  %96 = vadd.xlane.f32.xlu2 %v92_v18  ;;  %v689_v17 = vor.u32 %v827_v13, %v688_v12  ;;  %v690_v18 = vld [vmem:[#allocation6 + $0xa8] sm:$0xf0]  ;;  %v802_v13 = vld [vmem:[#allocation6 + $0x178] sm:$0xf0] }
  0x8a   :  { %v76_v19 = vpop.xlane.xlu1 %75  ;;  %v72_v20 = vpop.xlane.xlu0 %71 }
  0x8b   :  { %v87_v21 = vmul.f32 %v1018_v10, %v76_v19  ;;  %v85_v22 = vmul.f32 %v1018_v10, %v72_v20  ;;  %v696_v19 = vld [vmem:[#allocation6 + $0x98] sm:$0xf]  ;;  %v828_v20 = vld [vmem:[#allocation6 + $0xac] sm:$0xf0] }
  0x8d   :  { %v1032_v23 = vsub.f32 %v68_v2, %v87_v21  ;;  %v1034_v24 = vsub.f32 %v66_v3, %v85_v22  ;;  %v713_v2 = vor.u32 %v833_v0, %v712_v63  ;;  %v714_v3 = vld [vmem:[#allocation6 + $0xd8] sm:$0xf0]  ;;  %v693_v21 = vor.u32 %v824_v14, %v690_v18  ;;  %v624_v63 = vld [vmem:[#allocation6 + $0x8] sm:$0xf]  ;;  %v810_v0 = vld [vmem:[#allocation6 + $0x1c] sm:$0xf0] }
  0x8e   :  { %v717_v6 = vor.u32 %v830_v1, %v714_v3  ;;  %v697_v22 = vor.u32 %v828_v20, %v696_v19  ;;  %v807_v1 = vld [vmem:[#allocation6 + $0xc] sm:$0xf]  ;;  %v626_v3 = vld [vmem:[#allocation6 + $0x20] sm:$0xf0]  ;;  %v805_v18 = vor.u32 %v850_v7, %v802_v13  ;;  %v776_v19 = vld [vmem:[#allocation6 + $0x130] sm:$0xf] }
  0x8f   :  { %v95_v25 = vmul.f32 %v1032_v23, %v1032_v23  ;;  %v93_v26 = vmul.f32 %v1034_v24, %v1034_v24  ;;  %465 = vmatpush.bf16.msra.mxu0 %v713_v2  ;;  %v625_v2 = vor.u32 %v810_v0, %v624_v63  ;;  %v629_v4 = vor.u32 %v807_v1, %v626_v3  ;;  %v847_v20 = vld [vmem:[#allocation6 + $0x144] sm:$0xf0]  ;;  %v680_v0 = vld [vmem:[#allocation6 + $0x70] sm:$0xf]  ;;  %v820_v3 = vld [vmem:[#allocation6 + $0x74] sm:$0xf] }
  0x90   :  { %484 = vmatpush.bf16.msra.mxu1 %v717_v6  ;;  %504 = vmatpush.bf16.msra.mxu2 %v697_v22  ;;  %v853_v6 = vld [vmem:[#allocation6 + $0x174] sm:$0xf0]  ;;  %v777_v22 = vor.u32 %v847_v20, %v776_v19  ;;  %v709_v63 = vor.u32 %v826_v56, %v706_v60  ;;  %v823_v1 = vld [vmem:[#allocation6 + $0x84] sm:$0xf0] }
  0x91   :  { %102 = vadd.xlane.f32.xlu1 %v95_v25  ;;  %98 = vadd.xlane.f32.xlu2 %v93_v26  ;;  %v825_v25 = vld [vmem:[#allocation6 + $0x9c] sm:$0xf]  ;;  %v698_v26 = vld [vmem:[#allocation6 + $0xb0] sm:$0xf0]  ;;  %v801_v12 = vor.u32 %v853_v6, %v800_v5 }
  0x92   :  { %v701_v27 = vor.u32 %v825_v25, %v698_v26  ;;  %v778_v25 = vld [vmem:[#allocation6 + $0x148] sm:$0xf0]  ;;  %v752_v26 = vld [vmem:[#allocation6 + $0x100] sm:$0xf] }
  0x93   :  { %466 = vmatpush.bf16.msra.mxu0 %v689_v17 }
  0x94   :  { %485 = vmatpush.bf16.msra.mxu1 %v693_v21  ;;  %523 = vmatpush.bf16.msra.mxu3 %v701_v27  ;;  %v844_v21 = vld [vmem:[#allocation6 + $0x134] sm:$0xf] }
  0x95   :  { %505 = vmatpush.bf16.msra.mxu2 %v673_v36  ;;  %v781_v30 = vor.u32 %v844_v21, %v778_v25  ;;  %v757_v36 = vor.u32 %v838_v32, %v754_v33  ;;  %v634_v32 = vld [vmem:[#allocation6 + $0x28] sm:$0xf0] }
  0x97   :  { %467 = vmatpush.bf16.msra.mxu0 %v665_v31  ;;  %v841_v31 = vld [vmem:[#allocation6 + $0x114] sm:$0xf0] }
  0x98   :  { %486 = vmatpush.bf16.msra.mxu1 %v669_v35  ;;  %524 = vmatpush.bf16.msra.mxu3 %v677_v39  ;;  %v753_v35 = vor.u32 %v841_v31, %v752_v26  ;;  %v632_v26 = vld [vmem:[#allocation6 + $0x10] sm:$0xf] }
  0x99   :  { %506 = vmatpush.bf16.msra.mxu2 %v649_v49 }
  0x9b   :  { %468 = vmatpush.bf16.msra.mxu0 %v641_v43 }
  0x9c   :  { %487 = vmatpush.bf16.msra.mxu1 %v645_v48  ;;  %525 = vmatpush.bf16.msra.mxu3 %v653_v54  ;;  %v704_v54 = vld [vmem:[#allocation6 + $0xa0] sm:$0xf] }
  0x9d   :  { %507 = vmatpush.bf16.msra.mxu2 %v625_v2  ;;  %v681_v2 = vor.u32 %v823_v1, %v680_v0 }
  0x9f   :  { %469 = vmatpush.bf16.msra.mxu0 %v617_v59  ;;  %v705_v59 = vor.u32 %v829_v55, %v704_v54 }
  0xa0   :  { %488 = vmatpush.bf16.msra.mxu1 %v621_v62  ;;  %526 = vmatpush.bf16.msra.mxu3 %v629_v4  ;;  %v682_v4 = vld [vmem:[#allocation6 + $0x88] sm:$0xf0] }
  0xa1   :  { %854 = vmatpush.bf16.msrb.mxu2 %v801_v12  ;;  %v685_v7 = vor.u32 %v820_v3, %v682_v4 }
  0xa3   :  { %538 = vmatpush.bf16.msrb.mxu0 %v801_v12  ;;  %v878_v12 = vld [vmem:[%s1135_s1] ss:$0 sm:$0xff] }
  0xa4   :  { %862 = vmatpush.bf16.msrb.mxu3 %v805_v18  ;;  %557 = vmatpush.bf16.msrb.mxu1 %v805_v18 }
  0xa5   :  { %855 = vmatpush.bf16.msrb.mxu2 %v777_v22 }
  0xa7   :  { %539 = vmatpush.bf16.msrb.mxu0 %v777_v22 }
  0xa8   :  { %863 = vmatpush.bf16.msrb.mxu3 %v781_v30  ;;  %558 = vmatpush.bf16.msrb.mxu1 %v781_v30  ;;  %v879_v30 = vld [vmem:[#allocation4] ss:$0 sm:$0xff] }
  0xa9   :  { %856 = vmatpush.bf16.msrb.mxu2 %v753_v35 }
  0xab   :  { %540 = vmatpush.bf16.msrb.mxu0 %v753_v35 }
  0xac   :  { %864 = vmatpush.bf16.msrb.mxu3 %v757_v36  ;;  %559 = vmatpush.bf16.msrb.mxu1 %v757_v36 }
  0xad   :  { %857 = vmatpush.bf16.msrb.mxu2 %v729_v44 }
  0xaf   :  { %541 = vmatpush.bf16.msrb.mxu0 %v729_v44 }
  0xb0   :  { %865 = vmatpush.bf16.msrb.mxu3 %v733_v46  ;;  %560 = vmatpush.bf16.msrb.mxu1 %v733_v46 }
  0xb1   :  { %858 = vmatpush.bf16.msrb.mxu2 %v705_v59 }
  0xb3   :  { %542 = vmatpush.bf16.msrb.mxu0 %v705_v59 }
  0xb4   :  { %866 = vmatpush.bf16.msrb.mxu3 %v709_v63  ;;  %561 = vmatpush.bf16.msrb.mxu1 %v709_v63 }
  0xb5   :  { %859 = vmatpush.bf16.msrb.mxu2 %v681_v2 }
  0xb7   :  { %543 = vmatpush.bf16.msrb.mxu0 %v681_v2 }
  0xb8   :  { %867 = vmatpush.bf16.msrb.mxu3 %v685_v7  ;;  %562 = vmatpush.bf16.msrb.mxu1 %v685_v7 }
  0xfc   :  { %v97_v47 = vpop.xlane.xlu2 %96  ;;  %v101_v53 = vpop.xlane.xlu0 %100 }
  0xfd   :  { %v104_v52 = vmul.f32 %v97_v47, %v1018_v10  ;;  %v106_v61 = vmul.f32 %v101_v53, %v1018_v10 }
  0xff   :  { %v1041_v58 = vadd.f32 1e-05, %v104_v52  ;;  %v1045_v8 = vadd.f32 1e-05, %v106_v61 }
 0x101   :  { %882 = vrsqrt.f32 %v1041_v58  ;;  %vm118_vm2 = vweird.f32 %v1041_v58  ;;  %vm138_vm9 = vweird.f32 %v1045_v8 }
 0x102   :  { %884 = vrsqrt.f32 %v1045_v8 }
 0x104   :  { %v103_v9 = vpop.xlane.xlu1 %102  ;;  %v99_v11 = vpop.xlane.xlu2 %98 }
 0x105   :  { %v107_v14 = vmul.f32 %v103_v9, %v1018_v10  ;;  %v105_v17 = vmul.f32 %v99_v11, %v1018_v10  ;;  %v656_v9 = vld [vmem:[#allocation6 + $0x40] sm:$0xf]  ;;  %v817_v11 = vld [vmem:[#allocation6 + $0x54] sm:$0xf0] }
 0x106   :  { %v657_v20 = vor.u32 %v817_v11, %v656_v9 }
 0x107   :  { %v1049_v27 = vpop.eup %882  ;;  %v1051_v28 = vadd.f32 1e-05, %v107_v14  ;;  %v1053_v29 = vadd.f32 1e-05, %v105_v17  ;;  %v814_v14 = vld [vmem:[#allocation6 + $0x44] sm:$0xf] }
 0x108   :  { %v113_v10 = vmul.f32 %v1049_v27, %v1041_v58  ;;  %v1061_v42 = vpop.eup %884  ;;  %vm119_vm1 = vweird.f32 %v1049_v27  ;;  %v658_v17 = vld [vmem:[#allocation6 + $0x58] sm:$0xf0]  ;;  %860 = vmatpush.bf16.msrb.mxu2 %v657_v20  ;;  %544 = vmatpush.bf16.msrb.mxu0 %v657_v20 }
 0x109   :  { %886 = vrsqrt.f32 %v1051_v28  ;;  %v133_v50 = vmul.f32 %v1061_v42, %v1045_v8  ;;  %vm1074_vm3 = vmor %vm118_vm2, %vm119_vm1  ;;  %vm128_vm5 = vweird.f32 %v1053_v29  ;;  %v661_v25 = vor.u32 %v814_v14, %v658_v17 }
 0x10a   :  { %v114_v34 = vmul.f32 %v1049_v27, %v113_v10  ;;  %888 = vrsqrt.f32 %v1053_v29  ;;  %v808_v10 = vld [vmem:[#allocation6 + $0x14] sm:$0xf]  ;;  %vm148_vm7 = vweird.f32 %v1051_v28  ;;  %vm139_vm10 = vweird.f32 %v1061_v42 }
 0x10b   :  { %v134_v58 = vmul.f32 %v1061_v42, %v133_v50  ;;  %868 = vmatpush.bf16.msrb.mxu3 %v661_v25  ;;  %563 = vmatpush.bf16.msrb.mxu1 %v661_v25  ;;  %vm140_vm12 = vmor %vm138_vm9, %vm139_vm10 }
 0x10c   :  { %v115_v39 = vmul.f32 0.5, %v114_v34 }
 0x10d   :  { %v135_v18 = vmul.f32 0.5, %v134_v58 }
 0x10e   :  { %v116_v43 = vsub.f32 1.5, %v115_v39 }
 0x10f   :  { %v1063_v45 = vpop.eup %886  ;;  %v136_v33 = vsub.f32 1.5, %v135_v18 }
 0x110   :  { %v889_v47 = vpop.eup %888  ;;  %v143_v48 = vmul.f32 %v1063_v45, %v1051_v28  ;;  %v117_v49 = vmul.f32 %v1049_v27, %v116_v43  ;;  %vm149_vm8 = vweird.f32 %v1063_v45 }
 0x111   :  { %v123_v51 = vmul.f32 %v889_v47, %v1053_v29  ;;  %vm129_vm4 = vweird.f32 %v889_v47  ;;  %vm150_vm11 = vmor %vm148_vm7, %vm149_vm8  ;;  %v137_v28 = vmul.f32 %v1061_v42, %v136_v33 }
 0x112   :  { %v144_v52 = vmul.f32 %v1063_v45, %v143_v48  ;;  %v121_v61 = vsel %vm1074_vm3, %v1049_v27, %v117_v49  ;;  %vm130_vm6 = vmor %vm128_vm5, %vm129_vm4  ;;  %v811_v27 = vld [vmem:[#allocation6 + $0x24] sm:$0xf0] }
 0x113   :  { %v124_v53 = vmul.f32 %v889_v47, %v123_v51  ;;  %v152_v13 = vmul.f32 %v121_v61, %v1024_v16  ;;  %v633_v34 = vor.u32 %v811_v27, %v632_v26  ;;  %v141_v8 = vsel %vm140_vm12, %v1061_v42, %v137_v28 }
 0x114   :  { %v145_v5 = vmul.f32 0.5, %v144_v52  ;;  %v154_v41 = vmul.f32 %v141_v8, %v1022_v15 }
 0x115   :  { %v125_v62 = vmul.f32 0.5, %v124_v53  ;;  %v160_v31 = vmul.f32 %v878_v12, %v152_v13  ;;  %861 = vmatpush.bf16.msrb.mxu2 %v633_v34  ;;  %545 = vmatpush.bf16.msrb.mxu0 %v633_v34 }
 0x116   :  { %v146_v21 = vsub.f32 1.5, %v145_v5  ;;  %v162_v44 = vmul.f32 %v878_v12, %v154_v41 }
 0x117   :  { %v126_v6 = vsub.f32 1.5, %v125_v62  ;;  %v168_v36 = vadd.f32 %v879_v30, %v160_v31 }
 0x118   :  { %v147_v35 = vmul.f32 %v1063_v45, %v146_v21 }
 0x119   :  { %v127_v19 = vmul.f32 %v889_v47, %v126_v6 }
 0x11a   :  { %v151_v39 = vsel %vm150_vm11, %v1063_v45, %v147_v35 }
 0x11b   :  { %v131_v22 = vsel %vm130_vm6, %v889_v47, %v127_v19  ;;  %v155_v40 = vmul.f32 %v151_v39, %v1032_v23  ;;  %v170_v47 = vadd.f32 %v879_v30, %v162_v44 }
 0x11c   :  { %v153_v16 = vmul.f32 %v131_v22, %v1034_v24  ;;  %v637_v24 = vor.u32 %v808_v10, %v634_v32 }
 0x11d   :  { %v163_v43 = vmul.f32 %v878_v12, %v155_v40 }
 0x11e   :  { %v161_v29 = vmul.f32 %v878_v12, %v153_v16  ;;  %869 = vmatpush.bf16.msrb.mxu3 %v637_v24  ;;  %564 = vmatpush.bf16.msrb.mxu1 %v637_v24 }
 0x11f   :  { %v171_v46 = vadd.f32 %v879_v30, %v163_v43 }
 0x120   :  { %v169_v37 = vadd.f32 %v879_v30, %v161_v29 }
 0x121   :  { %v173_v48 = vpack.c.bf16 %v171_v46, %v170_v47 }
 0x122   :  { %v172_v38 = vpack.c.bf16 %v169_v37, %v168_v36 }
 0x124   :  { %470 = vmatmul.bf16.vlgmr.msra.gmra.mxu0 %v172_v38  ;;  %489 = vmatmul.bf16.vlgmr.msra.gmra.mxu1 %v172_v38 }
 0x125   :  { %508 = vmatmul.bf16.vlgmr.msra.gmra.mxu2 %v172_v38  ;;  %527 = vmatmul.bf16.vlgmr.msra.gmra.mxu3 %v172_v38 }
 0x134   :  { %475 = vmatmul.bf16.gmra.mxu0 %v173_v48  ;;  %494 = vmatmul.bf16.gmra.mxu1 %v173_v48 }
 0x135   :  { %513 = vmatmul.bf16.gmra.mxu2 %v173_v48  ;;  %532 = vmatmul.bf16.gmra.mxu3 %v173_v48 }
 0x144   :  { %546 = vmatmul.bf16.vlgmr.msrb.gmra.mxu0 %v172_v38  ;;  %565 = vmatmul.bf16.vlgmr.msrb.gmra.mxu1 %v172_v38 }
 0x145   :  { %551 = vmatmul.bf16.vlgmr.msrb.gmra.mxu2 %v173_v48  ;;  %570 = vmatmul.bf16.vlgmr.msrb.gmra.mxu3 %v173_v48 }
 0x1a1   :  { %v471_v42 = vpop.f32.mrf.mxu0  ;;  %v490_v45 = vpop.f32.mrf.mxu1 }
 0x1a2   :  { %v576_v49 = vpack.c.bf16 %v490_v45, %v471_v42 }
 0x1a4   :  { %580 = vst [vmem:[%s1138_s4] sm:$0xff] %v576_v49 }
 0x1a8   :  { %v509_v15 = vpop.f32.mrf.mxu2  ;;  %v528_v23 = vpop.f32.mrf.mxu3 }
 0x1a9   :  { %v584_v50 = vpack.c.bf16 %v528_v23, %v509_v15  ;;  %v473_v51 = vpop.f32.mrf.mxu0  ;;  %v492_v52 = vpop.f32.mrf.mxu1 }
 0x1aa   :  { %v577_v53 = vpack.c.bf16 %v492_v52, %v473_v51 }
 0x1ab   :  { %588 = vst [vmem:[%s1139_s5] sm:$0xff] %v584_v50 }
 0x1ac   :  { %581 = vst [vmem:[%s1138_s4 + $0x8] sm:$0xff] %v577_v53 }
 0x1b0   :  { %v511_v54 = vpop.f32.mrf.mxu2  ;;  %v530_v55 = vpop.f32.mrf.mxu3 }
 0x1b1   :  { %v585_v56 = vpack.c.bf16 %v530_v55, %v511_v54  ;;  %v476_v57 = vpop.f32.mrf.mxu0  ;;  %v495_v59 = vpop.f32.mrf.mxu1 }
 0x1b2   :  { %v578_v60 = vpack.c.bf16 %v495_v59, %v476_v57 }
 0x1b3   :  { %589 = vst [vmem:[%s1139_s5 + $0x8] sm:$0xff] %v585_v56 }
 0x1b4   :  { %582 = vst [vmem:[%s1138_s4 + $0x10] sm:$0xff] %v578_v60 }
 0x1b8   :  { %v514_v61 = vpop.f32.mrf.mxu2  ;;  %v533_v58 = vpop.f32.mrf.mxu3 }
 0x1b9   :  { %v586_v62 = vpack.c.bf16 %v533_v58, %v514_v61  ;;  %v478_v63 = vpop.f32.mrf.mxu0  ;;  %v497_v0 = vpop.f32.mrf.mxu1 }
 0x1ba   :  { %v579_v1 = vpack.c.bf16 %v497_v0, %v478_v63 }
 0x1bb   :  { %590 = vst [vmem:[%s1139_s5 + $0x10] sm:$0xff] %v586_v62 }
 0x1bc   :  { %583 = vst [vmem:[%s1138_s4 + $0x18] sm:$0xff] %v579_v1 }
 0x1c0   :  { %v516_v2 = vpop.f32.mrf.mxu2  ;;  %v535_v3 = vpop.f32.mrf.mxu3 }
 0x1c1   :  { %v587_v4 = vpack.c.bf16 %v535_v3, %v516_v2  ;;  %v547_v5 = vpop.f32.mrf.mxu0  ;;  %v566_v6 = vpop.f32.mrf.mxu1 }
 0x1c2   :  { %v592_v7 = vpack.c.bf16 %v566_v6, %v547_v5 }
 0x1c3   :  { %591 = vst [vmem:[%s1139_s5 + $0x18] sm:$0xff] %v587_v4 }
 0x1c4   :  { %596 = vst [vmem:[%s1140_s6] sm:$0xff] %v592_v7 }
 0x1c8   :  { %v552_v9 = vpop.f32.mrf.mxu2  ;;  %v571_v11 = vpop.f32.mrf.mxu3 }
 0x1c9   :  { %v594_v12 = vpack.c.bf16 %v571_v11, %v552_v9  ;;  %v549_v13 = vpop.f32.mrf.mxu0  ;;  %v568_v14 = vpop.f32.mrf.mxu1 }
 0x1ca   :  { %v593_v17 = vpack.c.bf16 %v568_v14, %v549_v13 }
 0x1cb   :  { %598 = vst [vmem:[%s1140_s6 + $0x10] sm:$0xff] %v594_v12 }
 0x1cc   :  { %597 = vst [vmem:[%s1140_s6 + $0x8] sm:$0xff] %v593_v17 }
 0x1d0   :  { %v554_v18 = vpop.f32.mrf.mxu2  ;;  %v573_v19 = vpop.f32.mrf.mxu3 }
 0x1d1   :  { %v595_v20 = vpack.c.bf16 %v573_v19, %v554_v18 }
 0x1d3   :  { %599 = vst [vmem:[%s1140_s6 + $0x18] sm:$0xff] %v595_v20 }
 0x1d4   :  { %612 = vsyncpa [#allocation3], 1 }
 0x1d5   :  { %613 = vsyncpa [#allocation5], 1 }

// kernel: attention_forward.5
= control target key start
LH: loop header
LB: loop body
LE: loop exit
PB: predicated region body
PF: predicated region fallthrough
CT: control target
= control target key end

     0   :  { %s478_s0 = inlined_call_operand.vmem [shape: bf16[32,256], index: 0, kind: input, shape index: {}]   ;;  %s479_s1 = inlined_call_operand.vmem [shape: bf16[256,128], index: 1, kind: input, shape index: {}]   ;;  %s480_s2 = inlined_call_operand.vmem [shape: f32[1,128], index: 2, kind: input, shape index: {}]   ;;  %s481_s3 = inlined_call_operand.hbm [shape: f32[32,128], index: 3, kind: output, shape index: {}]  }
   0x1   :  { %v322_v0 = vld [vmem:[%s479_s1 + $0x38] sm:$0xff]  ;;  %v321_v2 = vld [vmem:[%s479_s1 + $0x30] sm:$0xff]  ;;  %v320_v4 = vld [vmem:[%s479_s1 + $0x28] sm:$0xff] }
   0x2   :  { %v330_v1 = vld [vmem:[%s479_s1 + $0x78] sm:$0xff]  ;;  %171 = vmatpush.bf16.msra.mxu0 %v322_v0  ;;  %331 = vmatpush.bf16.msra.mxu2 %v322_v0  ;;  %v329_v3 = vld [vmem:[%s479_s1 + $0x70] sm:$0xff]  ;;  %v328_v5 = vld [vmem:[%s479_s1 + $0x68] sm:$0xff] }
   0x3   :  { %190 = vmatpush.bf16.msra.mxu1 %v330_v1  ;;  %339 = vmatpush.bf16.msra.mxu3 %v330_v1 }
   0x6   :  { %172 = vmatpush.bf16.msra.mxu0 %v321_v2  ;;  %332 = vmatpush.bf16.msra.mxu2 %v321_v2 }
   0x7   :  { %191 = vmatpush.bf16.msra.mxu1 %v329_v3  ;;  %340 = vmatpush.bf16.msra.mxu3 %v329_v3 }
   0x8   :  { %8 = vsyncpa [#allocation3], 0  ;;  %v319_v6 = vld [vmem:[%s479_s1 + $0x20] sm:$0xff]  ;;  %v318_v8 = vld [vmem:[%s479_s1 + $0x18] sm:$0xff]  ;;  %s378_s10 = smov 128   ;;  %s379_s11 = smov 8  }
   0x9   :  { %v327_v7 = vld [vmem:[%s479_s1 + $0x60] sm:$0xff]  ;;  %v326_v9 = vld [vmem:[%s479_s1 + $0x58] sm:$0xff]  ;;  %v317_v10 = vld [vmem:[%s479_s1 + $0x10] sm:$0xff] }
   0xa   :  { %173 = vmatpush.bf16.msra.mxu0 %v320_v4  ;;  %333 = vmatpush.bf16.msra.mxu2 %v320_v4  ;;  %v325_v11 = vld [vmem:[%s479_s1 + $0x50] sm:$0xff]  ;;  %v316_v12 = vld [vmem:[%s479_s1 + $0x8] sm:$0xff]  ;;  %v315_v14 = vld [vmem:[%s479_s1] sm:$0xff] }
   0xb   :  { %192 = vmatpush.bf16.msra.mxu1 %v328_v5  ;;  %341 = vmatpush.bf16.msra.mxu3 %v328_v5  ;;  %v324_v13 = vld [vmem:[%s479_s1 + $0x48] sm:$0xff]  ;;  %v323_v15 = vld [vmem:[%s479_s1 + $0x40] sm:$0xff]  ;;  %v241_v18 = vld [vmem:[%s478_s0 + $0x10] sm:$0xf] }
   0xc   :  { %v233_v16 = vld [vmem:[%s478_s0] sm:$0xf]  ;;  %v312_v17 = vld [vmem:[%s478_s0 + $0x4] sm:$0xf0]  ;;  %v314_v19 = vld [vmem:[%s478_s0 + $0x14] sm:$0xf0] }
   0xd   :  { %v311_v20 = vld [vmem:[%s478_s0 + $0x4] sm:$0xf]  ;;  %v235_v21 = vld [vmem:[%s478_s0 + $0x8] sm:$0xf0]  ;;  %v313_v22 = vld [vmem:[%s478_s0 + $0x14] sm:$0xf]  ;;  %v234_v24 = vor.u32 %v312_v17, %v233_v16  ;;  %v242_v25 = vor.u32 %v314_v19, %v241_v18 }
   0xe   :  { %174 = vmatpush.bf16.msra.mxu0 %v319_v6  ;;  %334 = vmatpush.bf16.msra.mxu2 %v319_v6  ;;  %v243_v23 = vld [vmem:[%s478_s0 + $0x18] sm:$0xf0]  ;;  %v238_v26 = vor.u32 %v311_v20, %v235_v21  ;;  %v350_v28 = vld [vmem:[%s480_s2] ss:$0 sm:$0xff]  ;;  %s377_s0 = smov [#allocation2]   ;;  %s219_s2 = sshll.u32 %s481_s3, 4  ;;  %s220_s2 = int_to_ptr.hbm [resolvable:$true] %s219_s2 }
   0xf   :  { %193 = vmatpush.bf16.msra.mxu1 %v327_v7  ;;  %342 = vmatpush.bf16.msra.mxu3 %v327_v7  ;;  %v246_v27 = vor.u32 %v313_v22, %v243_v23  ;;  %s217_s7 = sshll.u32 %s377_s0, 4  ;;  %s218_s7 = int_to_ptr.vmem [resolvable:$true] %s217_s7 }
  0x12   :  { %175 = vmatpush.bf16.msra.mxu0 %v318_v8  ;;  %335 = vmatpush.bf16.msra.mxu2 %v318_v8 }
  0x13   :  { %194 = vmatpush.bf16.msra.mxu1 %v326_v9  ;;  %343 = vmatpush.bf16.msra.mxu3 %v326_v9 }
  0x16   :  { %176 = vmatpush.bf16.msra.mxu0 %v317_v10  ;;  %336 = vmatpush.bf16.msra.mxu2 %v317_v10 }
  0x17   :  { %195 = vmatpush.bf16.msra.mxu1 %v325_v11  ;;  %344 = vmatpush.bf16.msra.mxu3 %v325_v11 }
  0x1a   :  { %177 = vmatpush.bf16.msra.mxu0 %v316_v12  ;;  %337 = vmatpush.bf16.msra.mxu2 %v316_v12 }
  0x1b   :  { %196 = vmatpush.bf16.msra.mxu1 %v324_v13  ;;  %345 = vmatpush.bf16.msra.mxu3 %v324_v13 }
  0x1e   :  { %178 = vmatpush.bf16.msra.mxu0 %v315_v14  ;;  %338 = vmatpush.bf16.msra.mxu2 %v315_v14 }
  0x1f   :  { %197 = vmatpush.bf16.msra.mxu1 %v323_v15  ;;  %346 = vmatpush.bf16.msra.mxu3 %v323_v15 }
  0x21   :  { %179 = vmatmul.bf16.vlgmr.msra.gmra.mxu0 %v234_v24  ;;  %184 = vmatmul.bf16.vlgmr.msra.gmra.mxu2 %v242_v25 }
  0x22   :  { %198 = vmatmul.bf16.vlgmr.msra.gmra.mxu1 %v238_v26  ;;  %203 = vmatmul.bf16.vlgmr.msra.gmra.mxu3 %v246_v27 }
  0x9e   :  { %v180_v29 = vpop.f32.mrf.mxu0 }
  0x9f   :  { %v181_v30 = vadd.f32 %v350_v28, %v180_v29  ;;  %v199_v31 = vpop.f32.mrf.mxu1 }
  0xa1   :  { %v200_v32 = vadd.f32 %v199_v31, %v181_v30 }
  0xa3   :  { %209 = vst [vmem:[#allocation2] sm:$0xff] %v200_v32 }
  0xa4   :  { %v185_v33 = vpop.f32.mrf.mxu2 }
  0xa5   :  { %v186_v34 = vadd.f32 %v350_v28, %v185_v33  ;;  %v204_v35 = vpop.f32.mrf.mxu3 }
  0xa6   :  { %v182_v36 = vpop.f32.mrf.mxu0 }
  0xa7   :  { %v205_v37 = vadd.f32 %v204_v35, %v186_v34  ;;  %v183_v38 = vadd.f32 %v350_v28, %v182_v36  ;;  %v201_v39 = vpop.f32.mrf.mxu1 }
  0xa9   :  { %211 = vst [vmem:[#allocation2 + $0x10] sm:$0xff] %v205_v37  ;;  %v202_v40 = vadd.f32 %v201_v39, %v183_v38 }
  0xab   :  { %210 = vst [vmem:[#allocation2 + $0x8] sm:$0xff] %v202_v40 }
  0xac   :  { %v187_v41 = vpop.f32.mrf.mxu2 }
  0xad   :  { %v188_v42 = vadd.f32 %v350_v28, %v187_v41  ;;  %v206_v43 = vpop.f32.mrf.mxu3 }
  0xaf   :  { %v207_v44 = vadd.f32 %v206_v43, %v188_v42 }
  0xb1   :  { %212 = vst [vmem:[#allocation2 + $0x18] sm:$0xff] %v207_v44 }
  0xb2   :  { %225 = dma.vmem_to_hbm [thread:$0]  %s218_s7, 512, %s220_s2, [#allocation3], %s378_s10, %s378_s10, %s379_s11  }
  0xb3   :  { %375 = dma.done.wait [#allocation3], 512  }
  0xb4   :  { %376 = vsyncadd [#allocation3], 4294966784 }
  0xb5   :  { %230 = vsyncpa [#allocation3], 1 }

// kernel: attention_forward.4
= control target key start
LH: loop header
LB: loop body
LE: loop exit
PB: predicated region body
PF: predicated region fallthrough
CT: control target
= control target key end

     0   :  { %vm143_vm0 = vcmask 130048   ;;  %s583_s1 = inlined_call_operand.vmem [shape: bf16[4,16,128], index: 1, kind: input, shape index: {}]   ;;  %s584_s0 = inlined_call_operand.vmem [shape: bf16[4,16,128], index: 0, kind: input, shape index: {}]   ;;  %s585_s2 = inlined_call_operand.vmem [shape: bf16[4,16,128], index: 2, kind: input, shape index: {}]   ;;  %s586_s3 = inlined_call_operand.vmem [shape: bf16[4,16,128], index: 3, kind: output, shape index: {}]  }
   0x1   :  { %v428_v0 = vld [vmem:[%s583_s1] sm:$0xff]  ;;  %v430_v1 = vld [vmem:[%s583_s1 + $0x10] sm:$0xff]  ;;  %v431_v2 = vld [vmem:[%s583_s1 + $0x18] sm:$0xff] }
   0x2   :  { %v429_v3 = vld [vmem:[%s583_s1 + $0x8] sm:$0xff]  ;;  %58 = vmatpush.bf16.xpose.msra.mxu0 %v428_v0  ;;  %110 = vmatpush.bf16.xpose.msra.mxu2 %v430_v1  ;;  %v424_v4 = vld [vmem:[%s584_s0] sm:$0xff]  ;;  %v426_v5 = vld [vmem:[%s584_s0 + $0x10] sm:$0xff] }
   0x3   :  { %136 = vmatpush.bf16.xpose.msra.mxu3 %v431_v2  ;;  %84 = vmatpush.bf16.xpose.msra.mxu1 %v429_v3  ;;  %v427_v6 = vld [vmem:[%s584_s0 + $0x18] sm:$0xff]  ;;  %v425_v7 = vld [vmem:[%s584_s0 + $0x8] sm:$0xff]  ;;  %v432_v24 = vld [vmem:[%s585_s2] sm:$0xff] }
   0x4   :  { %v434_v25 = vld [vmem:[%s585_s2 + $0x10] sm:$0xff]  ;;  %v435_v26 = vld [vmem:[%s585_s2 + $0x18] sm:$0xff]  ;;  %v433_v30 = vld [vmem:[%s585_s2 + $0x8] sm:$0xff] }
   0x9   :  { %59 = vmatmul.bf16.vlgmr.msra.gmra.mxu0 %v424_v4  ;;  %111 = vmatmul.bf16.vlgmr.msra.gmra.mxu2 %v426_v5 }
   0xa   :  { %137 = vmatmul.bf16.vlgmr.msra.gmra.mxu3 %v427_v6  ;;  %85 = vmatmul.bf16.vlgmr.msra.gmra.mxu1 %v425_v7 }
   0xb   :  { %245 = vmatpush.bf16.msrb.mxu0 %v432_v24  ;;  %301 = vmatpush.bf16.msrb.mxu2 %v434_v25 }
   0xc   :  { %329 = vmatpush.bf16.msrb.mxu3 %v435_v26  ;;  %273 = vmatpush.bf16.msrb.mxu1 %v433_v30 }
  0x86   :  { %v60_v8 = vpop.f32.mrf.mxu0 }
  0x87   :  { %v144_v9 = vsel %vm143_vm0, %v60_v8, -inf  ;;  %v539_v16 = vpop.f32.mrf.mxu1 }
  0x88   :  { %145 = vmax.xlane.f32.xlu2 %v144_v9  ;;  %v150_v22 = vsel %vm143_vm0, %v539_v16, -inf }
  0x8c   :  { %v112_v10 = vpop.f32.mrf.mxu2 }
  0x8d   :  { %v138_v11 = vpop.f32.mrf.mxu3  ;;  %v156_v12 = vsel %vm143_vm0, %v112_v10, -inf }
  0x8e   :  { %v162_v13 = vsel %vm143_vm0, %v138_v11, -inf  ;;  %157 = vmax.xlane.f32.xlu0 %v156_v12  ;;  %v62_v14 = vpop.f32.mrf.mxu0 }
  0x8f   :  { %163 = vmax.xlane.f32.xlu1 %v162_v13  ;;  %v147_v15 = vsel %vm143_vm0, %v62_v14, -inf  ;;  %v88_v21 = vpop.f32.mrf.mxu1 }
  0x90   :  { %148 = vmax.xlane.f32.xlu2 %v147_v15  ;;  %v153_v23 = vsel %vm143_vm0, %v88_v21, -inf }
  0x94   :  { %v114_v17 = vpop.f32.mrf.mxu2 }
  0x95   :  { %v140_v18 = vpop.f32.mrf.mxu3  ;;  %v159_v19 = vsel %vm143_vm0, %v114_v17, -inf }
  0x96   :  { %v165_v20 = vsel %vm143_vm0, %v140_v18, -inf  ;;  %160 = vmax.xlane.f32.xlu0 %v159_v19 }
  0x97   :  { %166 = vmax.xlane.f32.xlu1 %v165_v20 }
  0x9e   :  { %151 = vmax.xlane.f32.xlu0 %v150_v22 }
  0x9f   :  { %154 = vmax.xlane.f32.xlu1 %v153_v23 }
  0xfb   :  { %v146_v27 = vpop.xlane.xlu2 %145 }
  0xfc   :  { %v168_v28 = vsub.f32 %v60_v8, %v146_v27 }
  0xfe   :  { %v176_v29 = vmul.f32 1.442695, %v168_v28 }
 0x100   :  { %459 = vpow2.f32 %v176_v29 }
 0x101   :  { %v158_v31 = vpop.xlane.xlu0 %157 }
 0x102   :  { %v164_v32 = vpop.xlane.xlu1 %163  ;;  %v172_v33 = vsub.f32 %v112_v10, %v158_v31 }
 0x103   :  { %v174_v34 = vsub.f32 %v138_v11, %v164_v32  ;;  %v149_v35 = vpop.xlane.xlu2 %148 }
 0x104   :  { %v184_v36 = vmul.f32 1.442695, %v172_v33  ;;  %v169_v37 = vsub.f32 %v62_v14, %v149_v35 }
 0x105   :  { %v188_v40 = vmul.f32 1.442695, %v174_v34 }
 0x106   :  { %v460_v38 = vpop.eup %459  ;;  %461 = vpow2.f32 %v184_v36  ;;  %v178_v39 = vmul.f32 1.442695, %v169_v37 }
 0x107   :  { %v192_v41 = vsel %vm143_vm0, %v460_v38, 0.0  ;;  %v216_v48 = vpack.c.bf16 %v460_v38, %v460_v38 }
 0x108   :  { %463 = vpow2.f32 %v178_v39  ;;  %193 = vadd.xlane.f32.xlu2 %v192_v41 }
 0x109   :  { %v161_v42 = vpop.xlane.xlu0 %160  ;;  %465 = vpow2.f32 %v188_v40  ;;  %v226_v54 = vunpack.c.l.b16 %v216_v48 }
 0x10a   :  { %v167_v43 = vpop.xlane.xlu1 %166  ;;  %v173_v44 = vsub.f32 %v114_v17, %v161_v42 }
 0x10b   :  { %v175_v45 = vsub.f32 %v140_v18, %v167_v43 }
 0x10c   :  { %v462_v46 = vpop.eup %461  ;;  %v186_v47 = vmul.f32 1.442695, %v173_v44 }
 0x10d   :  { %v190_v49 = vmul.f32 1.442695, %v175_v45  ;;  %v204_v50 = vsel %vm143_vm0, %v462_v46, 0.0  ;;  %v220_v59 = vpack.c.bf16 %v462_v46, %v462_v46 }
 0x10e   :  { %v464_v51 = vpop.eup %463  ;;  %467 = vpow2.f32 %v186_v47  ;;  %205 = vadd.xlane.f32.xlu0 %v204_v50 }
 0x10f   :  { %v217_v52 = vpack.c.bf16 %v464_v51, %v464_v51  ;;  %469 = vpow2.f32 %v190_v49  ;;  %v466_v53 = vpop.eup %465  ;;  %v195_v4 = vsel %vm143_vm0, %v464_v51, 0.0  ;;  %v282_v6 = vunpack.c.l.b16 %v220_v59 }
 0x110   :  { %v222_v63 = vpack.c.bf16 %v466_v53, %v466_v53  ;;  %v210_v23 = vsel %vm143_vm0, %v466_v53, 0.0 }
 0x111   :  { %v227_v55 = vunpack.c.l.b16 %v217_v52  ;;  %v152_v56 = vpop.xlane.xlu0 %151 }
 0x112   :  { %v170_v57 = vsub.f32 %v539_v16, %v152_v56  ;;  %v155_v58 = vpop.xlane.xlu1 %154  ;;  %v310_v8 = vunpack.c.l.b16 %v222_v63 }
 0x113   :  { %v171_v60 = vsub.f32 %v88_v21, %v155_v58  ;;  %v228_v61 = vpack.c.b16 %v227_v55, %v226_v54 }
 0x114   :  { %v468_v62 = vpop.eup %467  ;;  %v180_v0 = vmul.f32 1.442695, %v170_v57 }
 0x115   :  { %v470_v1 = vpop.eup %469  ;;  %v221_v2 = vpack.c.bf16 %v468_v62, %v468_v62  ;;  %v182_v3 = vmul.f32 1.442695, %v171_v60  ;;  %408 = vmatmul.msk.bf16.vlgmr.msrb.gmra.mxu0 %vm143_vm0, %v228_v61  ;;  %v207_v22 = vsel %vm143_vm0, %v468_v62, 0.0 }
 0x116   :  { %v223_v5 = vpack.c.bf16 %v470_v1, %v470_v1  ;;  %471 = vpow2.f32 %v180_v0  ;;  %196 = vadd.xlane.f32.xlu0 %v195_v4  ;;  %v213_v16 = vsel %vm143_vm0, %v470_v1, 0.0 }
 0x117   :  { %v283_v7 = vunpack.c.l.b16 %v221_v2  ;;  %473 = vpow2.f32 %v182_v3 }
 0x118   :  { %v311_v9 = vunpack.c.l.b16 %v223_v5 }
 0x119   :  { %v284_v10 = vpack.c.b16 %v283_v7, %v282_v6 }
 0x11a   :  { %v312_v11 = vpack.c.b16 %v311_v9, %v310_v8 }
 0x11b   :  { %418 = vmatmul.msk.bf16.vlgmr.msrb.gmra.mxu2 %vm143_vm0, %v284_v10 }
 0x11c   :  { %v472_v12 = vpop.eup %471  ;;  %423 = vmatmul.msk.bf16.vlgmr.msrb.gmra.mxu3 %vm143_vm0, %v312_v11 }
 0x11d   :  { %v474_v13 = vpop.eup %473  ;;  %v218_v14 = vpack.c.bf16 %v472_v12, %v472_v12  ;;  %v198_v15 = vsel %vm143_vm0, %v472_v12, 0.0 }
 0x11e   :  { %v219_v17 = vpack.c.bf16 %v474_v13, %v474_v13  ;;  %199 = vadd.xlane.f32.xlu1 %v198_v15  ;;  %v201_v18 = vsel %vm143_vm0, %v474_v13, 0.0  ;;  %214 = vadd.xlane.f32.xlu0 %v213_v16 }
 0x11f   :  { %v254_v19 = vunpack.c.l.b16 %v218_v14  ;;  %202 = vadd.xlane.f32.xlu2 %v201_v18 }
 0x120   :  { %v255_v20 = vunpack.c.l.b16 %v219_v17 }
 0x122   :  { %v256_v21 = vpack.c.b16 %v255_v20, %v254_v19 }
 0x124   :  { %413 = vmatmul.msk.bf16.vlgmr.msrb.gmra.mxu1 %vm143_vm0, %v256_v21 }
 0x126   :  { %208 = vadd.xlane.f32.xlu1 %v207_v22 }
 0x127   :  { %211 = vadd.xlane.f32.xlu2 %v210_v23 }
 0x17b   :  { %v194_v25 = vpop.xlane.xlu2 %193 }
 0x17c   :  { %475 = vrcp.f32 %v194_v25 }
 0x181   :  { %v206_v24 = vpop.xlane.xlu0 %205 }
 0x182   :  { %v476_v30 = vpop.eup %475 }
 0x189   :  { %v197_v26 = vpop.xlane.xlu0 %196 }
 0x18a   :  { %477 = vrcp.f32 %v197_v26 }
 0x18b   :  { %479 = vrcp.f32 %v206_v24 }
 0x190   :  { %v478_v31 = vpop.eup %477 }
 0x191   :  { %v200_v29 = vpop.xlane.xlu1 %199  ;;  %v215_v38 = vpop.xlane.xlu0 %214 }
 0x192   :  { %v203_v27 = vpop.xlane.xlu2 %202  ;;  %v247_v28 = vpop.f32.mrf.mxu0 }
 0x193   :  { %v344_v33 = vmul.f32 %v476_v30, %v247_v28  ;;  %v480_v42 = vpop.eup %479 }
 0x199   :  { %v209_v36 = vpop.xlane.xlu1 %208 }
 0x19a   :  { %v249_v32 = vpop.f32.mrf.mxu0  ;;  %v212_v35 = vpop.xlane.xlu2 %211 }
 0x19b   :  { %v345_v34 = vmul.f32 %v478_v31, %v249_v32  ;;  %481 = vrcp.f32 %v212_v35 }
 0x19c   :  { %483 = vrcp.f32 %v209_v36 }
 0x19d   :  { %v439_v37 = vpack.c.bf16 %v345_v34, %v344_v33  ;;  %485 = vrcp.f32 %v215_v38 }
 0x19e   :  { %v303_v39 = vpop.f32.mrf.mxu2  ;;  %487 = vrcp.f32 %v200_v29 }
 0x19f   :  { %440 = vst [vmem:[%s586_s3] sm:$0xff] %v439_v37   ;;  %v331_v40 = vpop.f32.mrf.mxu3  ;;  %489 = vrcp.f32 %v203_v27  ;;  %v348_v47 = vmul.f32 %v480_v42, %v303_v39 }
 0x1a1   :  { %v275_v41 = vpop.f32.mrf.mxu1  ;;  %v482_v43 = vpop.eup %481 }
 0x1a2   :  { %v484_v44 = vpop.eup %483  ;;  %v350_v51 = vmul.f32 %v482_v43, %v331_v40 }
 0x1a3   :  { %v486_v46 = vpop.eup %485 }
 0x1a4   :  { %v488_v50 = vpop.eup %487 }
 0x1a5   :  { %v490_v53 = vpop.eup %489  ;;  %v346_v56 = vmul.f32 %v488_v50, %v275_v41 }
 0x1a6   :  { %v305_v45 = vpop.f32.mrf.mxu2 }
 0x1a7   :  { %v349_v48 = vmul.f32 %v484_v44, %v305_v45  ;;  %v333_v49 = vpop.f32.mrf.mxu3 }
 0x1a8   :  { %v351_v52 = vmul.f32 %v486_v46, %v333_v49 }
 0x1a9   :  { %v449_v54 = vpack.c.bf16 %v349_v48, %v348_v47  ;;  %v277_v55 = vpop.f32.mrf.mxu1 }
 0x1aa   :  { %v454_v57 = vpack.c.bf16 %v351_v52, %v350_v51  ;;  %v347_v58 = vmul.f32 %v490_v53, %v277_v55 }
 0x1ab   :  { %457 = vst [vmem:[%s586_s3 + $0x10] sm:$0xff] %v449_v54  }
 0x1ac   :  { %458 = vst [vmem:[%s586_s3 + $0x18] sm:$0xff] %v454_v57   ;;  %v444_v59 = vpack.c.bf16 %v347_v58, %v346_v56 }
 0x1ae   :  { %456 = vst [vmem:[%s586_s3 + $0x8] sm:$0xff] %v444_v59  }

</bundles_post_ra>
